<compile_context>
chip_gen: v6e
topology: v6e:2x2x1
jax: 0.10.0
libtpu: 0.0.40
codegen_flags: <defaults>
</compile_context>

<pallas_src>
import functools

import jax
import jax.numpy as jnp
from jax.experimental import pallas as pl
from jax.experimental.pallas import tpu as pltpu


_HAS_BUFFERED = hasattr(pl, "Buffered")


def _round_up(v, m):
    return ((v + m - 1) // m) * m


# --------------------------------------------------------------------------- #
# Kernel
# --------------------------------------------------------------------------- #
def mixer_layer_kernel(
    x_ref,          # (TN, Sp, Cp)   input block (f32 or bf16 stream)
    w_time_ref,     # (Sp, Sp)       TimeMixing.fc1.weight (PyTorch layout), matmul dtype
    b_time_ref,     # (Sp, 1)        TimeMixing.fc1.bias as a column (f32)
    bn1_scale_ref,  # (Sp, Cp)       folded eval-mode TimeBatchNorm2d (after time mixing)
    bn1_shift_ref,  # (Sp, Cp)
    w_fc1_ref,      # (Cp, Fp)       FeatureMixing.fc1.weight^T, matmul dtype
    b_fc1_ref,      # (1, Fp)        f32
    w_fc2_ref,      # (Fp, Op)       FeatureMixing.fc2.weight^T, matmul dtype
    w_proj_ref,     # (Cp, Op)       FeatureMixing.projection.weight^T, matmul dtype
    bn2_scale_ref,  # (Sp, Op)       folded eval-mode TimeBatchNorm2d (after feature mixing)
    bn2_shift_ref,  # (Sp, Op)       (includes folded b_proj + b_fc2)
    o_ref,          # (TN, Sp, Op)
):
    tn, sp, cp = x_ref.shape
    op = o_ref.shape[2]
    f32 = jnp.float32
    mm_dtype = w_fc1_ref.dtype

    x_in = x_ref[...]                       # streamed dtype (f32 or bf16)
    x = x_in.astype(f32)                    # f32 copy for the residual / BN math

    # ---------------- TimeMixing ----------------
    # t[n,s,c] = relu( sum_{s'} W_time[s,s'] * x[n,s',c] + b_time[s] )
    # ONE lane-stacked matmul W_time(S,S) @ X(S, TN*C); exactly one transpose+reshape
    # relayout each way (no per-batch slice/concat copies).
    x_lanes = jnp.transpose(x_in.astype(mm_dtype), (1, 0, 2)).reshape(sp, tn * cp)
    t_lanes = jnp.dot(w_time_ref[...], x_lanes,
                      preferred_element_type=f32)                     # (Sp, TN*Cp) f32
    # NOTE: b_time broadcasts into the zero-padded channel lanes; that is harmless
    # because (a) the padded rows of w_fc1/w_proj are zero and (b) bn1_scale/shift
    # are zero there — keep both zero-padding guarantees in the wrapper.
    t_lanes = jnp.maximum(t_lanes + b_time_ref[...], 0.0)
    # TODO(synk): dropout omitted (forward reproduced in eval/inference mode).
    t = jnp.transpose(t_lanes.reshape(sp, tn, cp), (1, 0, 2))         # (TN, Sp, Cp)

    # Residual + eval-mode TimeBatchNorm2d folded into a per-(s, c) affine,
    # broadcast once over the TN axis (BN tensors are NOT pre-tiled).
    y1 = (x + t) * bn1_scale_ref[...][None, :, :] + bn1_shift_ref[...][None, :, :]

    # ---------------- FeatureMixing (normalize_before=False) ----------------
    y1_mm = y1.reshape(tn * sp, cp).astype(mm_dtype)                  # (TN*Sp, Cp)
    x_proj = jnp.dot(y1_mm, w_proj_ref[...], preferred_element_type=f32)
    h = jnp.dot(y1_mm, w_fc1_ref[...], preferred_element_type=f32) + b_fc1_ref[...]
    h = jnp.maximum(h, 0.0)
    h = jnp.dot(h.astype(mm_dtype), w_fc2_ref[...], preferred_element_type=f32)
    # b_proj and b_fc2 are folded into bn2_shift (they commute with the final affine).
    out = (x_proj + h).reshape(tn, sp, op)
    out = out * bn2_scale_ref[...][None, :, :] + bn2_shift_ref[...][None, :, :]
    o_ref[...] = out.astype(o_ref.dtype)


# --------------------------------------------------------------------------- #
# VMEM sizing (generation-aware) and batch-block selection
# --------------------------------------------------------------------------- #
def _vmem_caps():
    """Return (vmem_limit_bytes, tn_budget_bytes), generation-aware.

    ~48 MiB limit / ~38 MiB budget on v7x (64 MiB per TC), ~96 MiB / ~77 MiB on
    v5e/v6e (128 MiB). Falls back to the conservative v7x numbers if the hardware
    query is unavailable (API probe only — never wraps the kernel itself)."""
    cap = None
    try:
        cap = int(pltpu.get_tpu_info().vmem_capacity_bytes)
    except Exception:
        cap = None
    if not cap:
        cap = 64 * 1024 * 1024
    limit = int(cap * 0.75)
    budget = int(cap * 0.60)
    return limit, budget


def _choose_batch_block(n, sp, cp, fp, op, *, budget, x_bytes, w_bytes,
                        single_buffer_consts):
    """Pick TN (batch elements per grid step) so TN*Sp fills MXU M-tiles (target
    512 rows) while the per-step VMEM working set fits `budget`. TN is capped so
    the grid has >=2 steps when N >= 2 (v7x megacore: both TCs get work; the extra
    step is negligible overhead on v5e/v6e)."""
    target_rows = 512
    tn = max(1, min(n, max(1, target_rows // sp)))
    tn = min(tn, max(1, -(-n // 2)))          # ceil(n/2): guarantee >= 2 grid steps

    const_mult = 1 if single_buffer_consts else 2
    consts = const_mult * (
        (sp * sp + cp * fp + fp * op + cp * op) * w_bytes     # matmul weights
        + (sp * 1 + 1 * fp) * 4                               # biases (f32)
        + 2 * (sp * cp + sp * op) * 4                         # BN scale/shift (untiled, f32)
    )

    def step_bytes(t):
        rows = t * sp
        io = 2 * rows * cp * x_bytes + 2 * rows * op * 4      # double-buffered x / out
        # Peak simultaneously-live f32 intermediates: x + (t|y1) + h + (x_proj|out).
        inter = rows * (2 * cp + fp + op) * 4
        return io + inter + consts

    while tn > 1 and step_bytes(tn) > budget:
        tn -= 1
    return tn


# --------------------------------------------------------------------------- #
# One-time parameter preparation (hoisted out of the per-call path)
# --------------------------------------------------------------------------- #
def prepare_mixer_params(params, *, use_bf16=True):
    """Zero-pad parameters to lane/sublane-dense sizes, fold the eval-mode BN stats
    and the post-nonlinearity biases, and cast matmul weights. Call ONCE and reuse
    the returned dict — this keeps pad/cast/fold XLA ops and weight HBM copies out
    of the per-inference-call path.

    use_bf16=True (recommended on v5e/v6e/v7x — the MXU is natively bf16 on all
    three) makes BOTH weights and activations bf16 in the matmuls, with f32
    accumulation; use_bf16=False keeps f32 operands for bit-clean parity."""
    f32 = jnp.float32
    mm_dtype = jnp.bfloat16 if use_bf16 else f32

    S = params["w_time"].shape[0]
    C_in, FF = params["w_fc1"].shape
    C_out = params["w_fc2"].shape[1]

    Sp = _round_up(S, 8)
    Cp = _round_up(C_in, 128)
    Fp = _round_up(FF, 128)
    Op = _round_up(C_out, 128)

    def pad2(a, r, c):
        a = jnp.asarray(a, f32)
        return jnp.pad(a, ((0, r - a.shape[0]), (0, c - a.shape[1])))

    # Fold b_proj + b_fc2 into the final affine's shift (they are added after the
    # last nonlinearity, so they commute with the BN affine).
    bias2 = params["b_proj"][0] + params["b_fc2"][0]                     # (C_out,)
    bn2_shift_eff = params["bn2_shift"] + bias2[None, :] * params["bn2_scale"]

    return dict(
        w_time=pad2(params["w_time"], Sp, Sp).astype(mm_dtype),
        b_time=pad2(params["b_time"], Sp, 1),
        bn1_scale=pad2(params["bn1_scale"], Sp, Cp),      # zero in padded lanes (required)
        bn1_shift=pad2(params["bn1_shift"], Sp, Cp),
        w_fc1=pad2(params["w_fc1"], Cp, Fp).astype(mm_dtype),   # zero padded rows (required)
        b_fc1=pad2(params["b_fc1"], 1, Fp),
        w_fc2=pad2(params["w_fc2"], Fp, Op).astype(mm_dtype),
        w_proj=pad2(params["w_proj"], Cp, Op).astype(mm_dtype), # zero padded rows (required)
        bn2_scale=pad2(params["bn2_scale"], Sp, Op),
        bn2_shift=pad2(bn2_shift_eff, Sp, Op),
    )


# --------------------------------------------------------------------------- #
# Wrapper (jit-friendly: all shape logic is static, prep is a dict-of-arrays)
# --------------------------------------------------------------------------- #
def mixer_layer(x, prep, *, c_out):
    """x: (N, S, C_in) float32; prep from prepare_mixer_params. Returns (N, S, c_out) f32.

    Matmul / x-streaming dtype follows prep (bf16 ⇒ activations AND weights are
    bf16 with f32 accumulation — expect small deviations vs an f32 reference)."""
    N, S, C_in = x.shape
    f32 = jnp.float32
    Sp, Cp = prep["bn1_scale"].shape
    Fp, Op = prep["w_fc2"].shape
    mm_dtype = prep["w_fc1"].dtype
    use_bf16 = mm_dtype == jnp.bfloat16
    x_dtype = mm_dtype                          # stream x HBM->VMEM in the matmul dtype
    x_bytes = 2 if use_bf16 else 4
    w_bytes = 2 if use_bf16 else 4

    vmem_limit, budget = _vmem_caps()
    tn = _choose_batch_block(N, Sp, Cp, Fp, Op, budget=budget, x_bytes=x_bytes,
                             w_bytes=w_bytes, single_buffer_consts=_HAS_BUFFERED)
    Np = _round_up(N, tn)                       # padded batch rows compute discarded work
    grid = (Np // tn,)

    xp = jnp.pad(x.astype(x_dtype), ((0, Np - N), (0, Sp - S), (0, Cp - C_in)))

    def const_spec(shape):
        nd = len(shape)
        idx = lambda n, _nd=nd: (0,) * _nd
        if _HAS_BUFFERED:
            # Constant index_map -> a second pipeline buffer is pure VMEM waste.
            return pl.BlockSpec(shape, idx, pipeline_mode=pl.Buffered(1))
        return pl.BlockSpec(shape, idx)

    grid_spec = pltpu.PrefetchScalarGridSpec(
        num_scalar_prefetch=0,
        grid=grid,
        in_specs=[
            pl.BlockSpec((tn, Sp, Cp), lambda n: (n, 0, 0)),
            const_spec((Sp, Sp)),
            const_spec((Sp, 1)),
            const_spec((Sp, Cp)),
            const_spec((Sp, Cp)),
            const_spec((Cp, Fp)),
            const_spec((1, Fp)),
            const_spec((Fp, Op)),
            const_spec((Cp, Op)),
            const_spec((Sp, Op)),
            const_spec((Sp, Op)),
        ],
        out_specs=pl.BlockSpec((tn, Sp, Op), lambda n: (n, 0, 0)),
    )

    out = pl.pallas_call(
        mixer_layer_kernel,
        out_shape=jax.ShapeDtypeStruct((Np, Sp, Op), f32),
        grid_spec=grid_spec,
        compiler_params=pltpu.CompilerParams(
            dimension_semantics=("parallel",),      # batch grid shards across v7x's 2 TCs
            vmem_limit_bytes=vmem_limit,            # generation-aware scoped-VMEM limit
        ),
    )(xp, prep["w_time"], prep["b_time"], prep["bn1_scale"], prep["bn1_shift"],
      prep["w_fc1"], prep["b_fc1"], prep["w_fc2"], prep["w_proj"],
      prep["bn2_scale"], prep["bn2_shift"])

    # TODO(synk): for very narrow channel counts (C_out << 128) measure an
    # unpadded-lane output variant; the padded f32 output writes Op/C_out x more HBM.
    return out[:N, :S, :c_out]


# --------------------------------------------------------------------------- #
# Synthetic parameters + plain-JAX reference (for verification)
# --------------------------------------------------------------------------- #
def make_params(key, S, C_in, C_out, FF, eps=1e-5):
    """Deterministic synthetic parameters mirroring the PyTorch module shapes."""
    ks = jax.random.split(key, 16)
    f32 = jnp.float32

    def rnd(k, shape, scale=0.1):
        return (scale * jax.random.normal(k, shape)).astype(f32)

    # TimeMixing.fc1 : Linear(S, S)
    w_time = rnd(ks[0], (S, S))
    b_time = rnd(ks[1], (S, 1))

    # TimeMixing.norm : TimeBatchNorm2d((S, C_in))
    g1 = 1.0 + rnd(ks[2], (S, C_in))
    beta1 = rnd(ks[3], (S, C_in))
    mean1 = rnd(ks[4], (S, C_in))
    var1 = 1.0 + 0.1 * jnp.abs(jax.random.normal(ks[5], (S, C_in))).astype(f32)
    bn1_scale = g1 / jnp.sqrt(var1 + eps)
    bn1_shift = beta1 - mean1 * bn1_scale

    # FeatureMixing.fc1 : Linear(C_in, FF); fc2 : Linear(FF, C_out)   (weights stored ^T)
    w_fc1 = rnd(ks[6], (C_in, FF))
    b_fc1 = rnd(ks[7], (1, FF))
    w_fc2 = rnd(ks[8], (FF, C_out))
    b_fc2 = rnd(ks[9], (1, C_out))

    # FeatureMixing.projection : Linear(C_in, C_out) (C_in != C_out here)
    w_proj = rnd(ks[10], (C_in, C_out))
    b_proj = rnd(ks[11], (1, C_out))

    # FeatureMixing.norm_after : TimeBatchNorm2d((S, C_out))
    g2 = 1.0 + rnd(ks[12], (S, C_out))
    beta2 = rnd(ks[13], (S, C_out))
    mean2 = rnd(ks[14], (S, C_out))
    var2 = 1.0 + 0.1 * jnp.abs(jax.random.normal(ks[15], (S, C_out))).astype(f32)
    bn2_scale = g2 / jnp.sqrt(var2 + eps)
    bn2_shift = beta2 - mean2 * bn2_scale

    return dict(
        w_time=w_time, b_time=b_time,
        bn1_scale=bn1_scale.astype(f32), bn1_shift=bn1_shift.astype(f32),
        w_fc1=w_fc1, b_fc1=b_fc1, w_fc2=w_fc2, b_fc2=b_fc2,
        w_proj=w_proj, b_proj=b_proj,
        bn2_scale=bn2_scale.astype(f32), bn2_shift=bn2_shift.astype(f32),
    )


def mixer_layer_reference(x, p):
    """Plain-JAX reference with identical (eval-mode) semantics."""
    # TimeMixing
    x_t = jnp.transpose(x, (0, 2, 1))                       # (N, C, S)
    h = jnp.maximum(jnp.einsum("ncs,ts->nct", x_t, p["w_time"])
                    + p["b_time"][:, 0], 0.0)
    x_res = jnp.transpose(h, (0, 2, 1))                     # (N, S, C)
    y1 = (x + x_res) * p["bn1_scale"] + p["bn1_shift"]
    # FeatureMixing (normalize_before=False)
    x_proj = jnp.einsum("nsc,co->nso", y1, p["w_proj"]) + p["b_proj"][0]
    z = jnp.maximum(jnp.einsum("nsc,cf->nsf", y1, p["w_fc1"]) + p["b_fc1"][0], 0.0)
    z = jnp.einsum("nsf,fo->nso", z, p["w_fc2"]) + p["b_fc2"][0]
    out = x_proj + z
    return out * p["bn2_scale"] + p["bn2_shift"]


# --------------------------------------------------------------------------- #
# Main
# --------------------------------------------------------------------------- #
if __name__ == "__main__":
    N, S, C_in, C_out, FF = 2, 8, 4, 6, 32

    key = jax.random.PRNGKey(0)
    kx, kp = jax.random.split(key)
    x = jax.random.normal(kx, (N, S, C_in), dtype=jnp.float32)
    params = make_params(kp, S, C_in, C_out, FF)

    ref = jax.block_until_ready(mixer_layer_reference(x, params))

    run = jax.jit(functools.partial(mixer_layer, c_out=C_out))

    # f32-operand MXU path (bit-clean vs reference).
    prep_f32 = prepare_mixer_params(params, use_bf16=False)
    out = jax.block_until_ready(run(x, prep_f32))
    assert out.shape == (N, S, C_out)
    assert jnp.allclose(out, ref, atol=1e-5, rtol=1e-5), "f32 kernel mismatch vs reference"

    # bf16 activation+weight MXU path (recommended on v5e / v6e / v7x).
    prep_bf16 = prepare_mixer_params(params, use_bf16=True)
    out_bf16 = jax.block_until_ready(run(x, prep_bf16))
    assert out_bf16.shape == (N, S, C_out)
    assert jnp.allclose(out_bf16, ref, atol=5e-2, rtol=5e-2), "bf16 kernel mismatch vs reference"

    print("KERNEL_OK")
</pallas_src>

<mosaic_0001>
module attributes {stable_mosaic.version = 11 : i64} {
  func.func @mixer_layer_kernel(%arg0: i32, %arg1: memref<1x8x128xf32, #tpu.memory_space<vmem>>, %arg2: memref<8x8xf32, #tpu.memory_space<vmem>>, %arg3: memref<8x1xf32, #tpu.memory_space<vmem>>, %arg4: memref<8x128xf32, #tpu.memory_space<vmem>>, %arg5: memref<8x128xf32, #tpu.memory_space<vmem>>, %arg6: memref<128x128xf32, #tpu.memory_space<vmem>>, %arg7: memref<1x128xf32, #tpu.memory_space<vmem>>, %arg8: memref<128x128xf32, #tpu.memory_space<vmem>>, %arg9: memref<128x128xf32, #tpu.memory_space<vmem>>, %arg10: memref<8x128xf32, #tpu.memory_space<vmem>>, %arg11: memref<8x128xf32, #tpu.memory_space<vmem>>, %arg12: memref<1x8x128xf32, #tpu.memory_space<vmem>>) attributes {dimension_semantics = [#tpu.dimension_semantics<parallel>], iteration_bounds = array<i64: 2>, scalar_prefetch = 0 : i64, scratch_operands = 0 : i64, tpu.core_type = #tpu.core_type<tc>, window_params = [{transform_indices = @transform_0, window_bounds = array<i64: 1, 8, 128>}, {pipeline_mode = #tpu.pipeline_mode<synchronous>, transform_indices = @transform_1, window_bounds = array<i64: 8, 8>}, {pipeline_mode = #tpu.pipeline_mode<synchronous>, transform_indices = @transform_2, window_bounds = array<i64: 8, 1>}, {pipeline_mode = #tpu.pipeline_mode<synchronous>, transform_indices = @transform_3, window_bounds = array<i64: 8, 128>}, {pipeline_mode = #tpu.pipeline_mode<synchronous>, transform_indices = @transform_4, window_bounds = array<i64: 8, 128>}, {pipeline_mode = #tpu.pipeline_mode<synchronous>, transform_indices = @transform_5, window_bounds = array<i64: 128, 128>}, {pipeline_mode = #tpu.pipeline_mode<synchronous>, transform_indices = @transform_6, window_bounds = array<i64: 1, 128>}, {pipeline_mode = #tpu.pipeline_mode<synchronous>, transform_indices = @transform_7, window_bounds = array<i64: 128, 128>}, {pipeline_mode = #tpu.pipeline_mode<synchronous>, transform_indices = @transform_8, window_bounds = array<i64: 128, 128>}, {pipeline_mode = #tpu.pipeline_mode<synchronous>, transform_indices = @transform_9, window_bounds = array<i64: 8, 128>}, {pipeline_mode = #tpu.pipeline_mode<synchronous>, transform_indices = @transform_10, window_bounds = array<i64: 8, 128>}, {transform_indices = @transform_11, window_bounds = array<i64: 1, 8, 128>}]} {
    %c0 = arith.constant 0 : index
    %c0_0 = arith.constant 0 : index
    %c0_1 = arith.constant 0 : index
    %0 = vector.load %arg1[%c0, %c0_0, %c0_1] : memref<1x8x128xf32, #tpu.memory_space<vmem>>, vector<1x8x128xf32>
    %1 = tpu.transpose %0, [1, 0, 2] : vector<1x8x128xf32> -> vector<8x1x128xf32>
    %2 = vector.shape_cast %1 : vector<8x1x128xf32> to vector<8x128xf32>
    %c0_2 = arith.constant 0 : index
    %c0_3 = arith.constant 0 : index
    %3 = vector.load %arg2[%c0_2, %c0_3] : memref<8x8xf32, #tpu.memory_space<vmem>>, vector<8x8xf32>
    %cst = arith.constant dense<0.000000e+00> : vector<8x128xf32>
    %4 = tpu.matmul %3, %2, %cst {dimension_numbers = #tpu.dot_dimension_numbers<[1], [0], [0], [1], [0, 0, 1, 1], [], []>} : vector<8x8xf32>, vector<8x128xf32>, vector<8x128xf32> -> vector<8x128xf32>
    %c0_4 = arith.constant 0 : index
    %c0_5 = arith.constant 0 : index
    %5 = vector.load %arg3[%c0_4, %c0_5] : memref<8x1xf32, #tpu.memory_space<vmem>>, vector<8x1xf32>
    %6 = vector.broadcast %5 : vector<8x1xf32> to vector<8x128xf32>
    %7 = arith.addf %4, %6 : vector<8x128xf32>
    %cst_6 = arith.constant 0.000000e+00 : f32
    %8 = vector.broadcast %cst_6 : f32 to vector<8x128xf32>
    %9 = arith.maximumf %7, %8 : vector<8x128xf32>
    %10 = vector.shape_cast %9 : vector<8x128xf32> to vector<8x1x128xf32>
    %11 = tpu.transpose %10, [1, 0, 2] : vector<8x1x128xf32> -> vector<1x8x128xf32>
    %12 = arith.addf %0, %11 : vector<1x8x128xf32>
    %c0_7 = arith.constant 0 : index
    %c0_8 = arith.constant 0 : index
    %13 = vector.load %arg4[%c0_7, %c0_8] : memref<8x128xf32, #tpu.memory_space<vmem>>, vector<8x128xf32>
    %14 = vector.shape_cast %13 : vector<8x128xf32> to vector<1x8x128xf32>
    %15 = arith.mulf %12, %14 : vector<1x8x128xf32>
    %c0_9 = arith.constant 0 : index
    %c0_10 = arith.constant 0 : index
    %16 = vector.load %arg5[%c0_9, %c0_10] : memref<8x128xf32, #tpu.memory_space<vmem>>, vector<8x128xf32>
    %17 = vector.shape_cast %16 : vector<8x128xf32> to vector<1x8x128xf32>
    %18 = arith.addf %15, %17 : vector<1x8x128xf32>
    %19 = vector.shape_cast %18 : vector<1x8x128xf32> to vector<8x128xf32>
    %c0_11 = arith.constant 0 : index
    %c0_12 = arith.constant 0 : index
    %20 = vector.load %arg9[%c0_11, %c0_12] : memref<128x128xf32, #tpu.memory_space<vmem>>, vector<128x128xf32>
    %cst_13 = arith.constant dense<0.000000e+00> : vector<8x128xf32>
    %21 = tpu.matmul %19, %20, %cst_13 {dimension_numbers = #tpu.dot_dimension_numbers<[1], [0], [0], [1], [0, 0, 1, 1], [], []>} : vector<8x128xf32>, vector<128x128xf32>, vector<8x128xf32> -> vector<8x128xf32>
    %c0_14 = arith.constant 0 : index
    %c0_15 = arith.constant 0 : index
    %22 = vector.load %arg6[%c0_14, %c0_15] : memref<128x128xf32, #tpu.memory_space<vmem>>, vector<128x128xf32>
    %cst_16 = arith.constant dense<0.000000e+00> : vector<8x128xf32>
    %23 = tpu.matmul %19, %22, %cst_16 {dimension_numbers = #tpu.dot_dimension_numbers<[1], [0], [0], [1], [0, 0, 1, 1], [], []>} : vector<8x128xf32>, vector<128x128xf32>, vector<8x128xf32> -> vector<8x128xf32>
    %c0_17 = arith.constant 0 : index
    %c0_18 = arith.constant 0 : index
    %24 = vector.load %arg7[%c0_17, %c0_18] : memref<1x128xf32, #tpu.memory_space<vmem>>, vector<1x128xf32>
    %25 = vector.broadcast %24 : vector<1x128xf32> to vector<8x128xf32>
    %26 = arith.addf %23, %25 : vector<8x128xf32>
    %cst_19 = arith.constant 0.000000e+00 : f32
    %27 = vector.broadcast %cst_19 : f32 to vector<8x128xf32>
    %28 = arith.maximumf %26, %27 : vector<8x128xf32>
    %c0_20 = arith.constant 0 : index
    %c0_21 = arith.constant 0 : index
    %29 = vector.load %arg8[%c0_20, %c0_21] : memref<128x128xf32, #tpu.memory_space<vmem>>, vector<128x128xf32>
    %cst_22 = arith.constant dense<0.000000e+00> : vector<8x128xf32>
    %30 = tpu.matmul %28, %29, %cst_22 {dimension_numbers = #tpu.dot_dimension_numbers<[1], [0], [0], [1], [0, 0, 1, 1], [], []>} : vector<8x128xf32>, vector<128x128xf32>, vector<8x128xf32> -> vector<8x128xf32>
    %31 = arith.addf %21, %30 : vector<8x128xf32>
    %32 = vector.shape_cast %31 : vector<8x128xf32> to vector<1x8x128xf32>
    %c0_23 = arith.constant 0 : index
    %c0_24 = arith.constant 0 : index
    %33 = vector.load %arg10[%c0_23, %c0_24] : memref<8x128xf32, #tpu.memory_space<vmem>>, vector<8x128xf32>
    %34 = vector.shape_cast %33 : vector<8x128xf32> to vector<1x8x128xf32>
    %35 = arith.mulf %32, %34 : vector<1x8x128xf32>
    %c0_25 = arith.constant 0 : index
    %c0_26 = arith.constant 0 : index
    %36 = vector.load %arg11[%c0_25, %c0_26] : memref<8x128xf32, #tpu.memory_space<vmem>>, vector<8x128xf32>
    %37 = vector.shape_cast %36 : vector<8x128xf32> to vector<1x8x128xf32>
    %38 = arith.addf %35, %37 : vector<1x8x128xf32>
    %c0_27 = arith.constant 0 : index
    %c0_28 = arith.constant 0 : index
    %c0_29 = arith.constant 0 : index
    %39 = vector.load %arg12[%c0_27, %c0_28, %c0_29] : memref<1x8x128xf32, #tpu.memory_space<vmem>>, vector<1x8x128xf32>
    tpu.vector_store %arg12[%c0_27, %c0_28, %c0_29], %38 {strides = array<i32>} : memref<1x8x128xf32, #tpu.memory_space<vmem>>, vector<1x8x128xf32>,
    return
  }
  func.func @transform_0(%arg0: i32) -> (i32, i32, i32) {
    %c0_i32 = arith.constant 0 : i32
    %c0_i32_0 = arith.constant 0 : i32
    %c0_i32_1 = arith.constant 0 : i32
    return %arg0, %c0_i32, %c0_i32_0 : i32, i32, i32
  }
  func.func @transform_1(%arg0: i32) -> (i32, i32) {
    %c0_i32 = arith.constant 0 : i32
    %c0_i32_0 = arith.constant 0 : i32
    %c0_i32_1 = arith.constant 0 : i32
    return %c0_i32, %c0_i32_0 : i32, i32
  }
  func.func @transform_2(%arg0: i32) -> (i32, i32) {
    %c0_i32 = arith.constant 0 : i32
    %c0_i32_0 = arith.constant 0 : i32
    %c0_i32_1 = arith.constant 0 : i32
    return %c0_i32, %c0_i32_0 : i32, i32
  }
  func.func @transform_3(%arg0: i32) -> (i32, i32) {
    %c0_i32 = arith.constant 0 : i32
    %c0_i32_0 = arith.constant 0 : i32
    %c0_i32_1 = arith.constant 0 : i32
    return %c0_i32, %c0_i32_0 : i32, i32
  }
  func.func @transform_4(%arg0: i32) -> (i32, i32) {
    %c0_i32 = arith.constant 0 : i32
    %c0_i32_0 = arith.constant 0 : i32
    %c0_i32_1 = arith.constant 0 : i32
    return %c0_i32, %c0_i32_0 : i32, i32
  }
  func.func @transform_5(%arg0: i32) -> (i32, i32) {
    %c0_i32 = arith.constant 0 : i32
    %c0_i32_0 = arith.constant 0 : i32
    %c0_i32_1 = arith.constant 0 : i32
    return %c0_i32, %c0_i32_0 : i32, i32
  }
  func.func @transform_6(%arg0: i32) -> (i32, i32) {
    %c0_i32 = arith.constant 0 : i32
    %c0_i32_0 = arith.constant 0 : i32
    %c0_i32_1 = arith.constant 0 : i32
    return %c0_i32, %c0_i32_0 : i32, i32
  }
  func.func @transform_7(%arg0: i32) -> (i32, i32) {
    %c0_i32 = arith.constant 0 : i32
    %c0_i32_0 = arith.constant 0 : i32
    %c0_i32_1 = arith.constant 0 : i32
    return %c0_i32, %c0_i32_0 : i32, i32
  }
  func.func @transform_8(%arg0: i32) -> (i32, i32) {
    %c0_i32 = arith.constant 0 : i32
    %c0_i32_0 = arith.constant 0 : i32
    %c0_i32_1 = arith.constant 0 : i32
    return %c0_i32, %c0_i32_0 : i32, i32
  }
  func.func @transform_9(%arg0: i32) -> (i32, i32) {
    %c0_i32 = arith.constant 0 : i32
    %c0_i32_0 = arith.constant 0 : i32
    %c0_i32_1 = arith.constant 0 : i32
    return %c0_i32, %c0_i32_0 : i32, i32
  }
  func.func @transform_10(%arg0: i32) -> (i32, i32) {
    %c0_i32 = arith.constant 0 : i32
    %c0_i32_0 = arith.constant 0 : i32
    %c0_i32_1 = arith.constant 0 : i32
    return %c0_i32, %c0_i32_0 : i32, i32
  }
  func.func @transform_11(%arg0: i32) -> (i32, i32, i32) {
    %c0_i32 = arith.constant 0 : i32
    %c0_i32_0 = arith.constant 0 : i32
    %c0_i32_1 = arith.constant 0 : i32
    return %arg0, %c0_i32, %c0_i32_0 : i32, i32, i32
  }
}

</mosaic_0001>

<bundles_post_ra>
// kernel: mixer_layer.1
= control target key start
LH: loop header
LB: loop body
LE: loop exit
PB: predicated region body
PF: predicated region fallthrough
CT: control target
= control target key end

     0   :  { %16 = vsyncpa [#allocation3], 0  ;;  %s1622_s0 = inlined_call_operand.vmem [shape: f32[2,8,128], index: 0, kind: input, shape index: {}]   ;;  %s1623_s1 = inlined_call_operand.vmem [shape: f32[8,8], index: 1, kind: input, shape index: {}]   ;;  %s1624_s2 = inlined_call_operand.vmem [shape: f32[8,1], index: 2, kind: input, shape index: {}]   ;;  %s1625_s3 = inlined_call_operand.vmem [shape: f32[8,128], index: 3, kind: input, shape index: {}]   ;;  %s1626_s4 = inlined_call_operand.vmem [shape: f32[8,128], index: 4, kind: input, shape index: {}]   ;;  %s1627_s5 = inlined_call_operand.hbm [shape: f32[128,128], index: 5, kind: input, shape index: {}]   ;;  %s1628_s6 = inlined_call_operand.vmem [shape: f32[1,128], index: 6, kind: input, shape index: {}]   ;;  %s1629_s7 = inlined_call_operand.hbm [shape: f32[128,128], index: 7, kind: input, shape index: {}]   ;;  %s1630_s8 = inlined_call_operand.hbm [shape: f32[128,128], index: 8, kind: input, shape index: {}]   ;;  %s1631_s9 = inlined_call_operand.vmem [shape: f32[8,128], index: 9, kind: input, shape index: {}]   ;;  %s1632_s10 = inlined_call_operand.vmem [shape: f32[8,128], index: 10, kind: input, shape index: {}]   ;;  %s1633_s11 = inlined_call_operand.vmem [shape: f32[2,8,128], index: 11, kind: output, shape index: {}]  }
   0x1   :  { %17 = vsyncpa [#allocation5], 0  ;;  %s1443_s17 = smov 0  }
   0x2 LB: > { %s1449_s18 = sadd.s32 4294967295, %s1370_s17   ;;  %p1050_p0 = scmp.ge.s32.totalorder %s1370_s17, 1  ;;  %s1370_s17 = sphi %s1443_s17, %s23_s17  }
   0x3   : > { %p290_p1 = scmp.lt.s32.totalorder %s1370_s17, 3  ;;  %p1252_p2 = scmp.eq.s32.totalorder %s1449_s18, 0 }
   0x4   : > { %s1372_s20 = smov [#allocation4]   ;;  %s1373_s22 = smov [#allocation2]  }
   0x5   : > { %p1454_p3 = pnand %p1050_p0, %p290_p1  ;;  %s330_s21 = sshll.u32 %s1372_s20, 4  ;;  %s331_s21 = int_to_ptr.vmem [resolvable:$true] %s330_s21 }
   0x6   : > { %s314_s23 = sshll.u32 %s1373_s22, 4  ;;  %s1374_s25 = smov [#allocation6]   ;;  %s315_s23 = int_to_ptr.vmem [resolvable:$true] %s314_s23 }
   0x7   : > { %p1242_p4 = pneg %p1454_p3  ;;  %s343_s26 = sshll.u32 %s1374_s25, 4  ;;  %s1466_s26 = int_to_ptr.vmem [resolvable:$true] %s343_s26 }
   0x8   : > { %s1289_s27 = scalar_lea.vmem %s331_s21, 2048  ;;  %p1297_p10 = scmp.lt.s32.totalorder %s331_s21, %s331_s21 }
   0x9   : > { %p1462_p5 = pnand %p1252_p2, %p1242_p4  ;;  %p1290_p7 = scmp.ne.s32.totalorder %s331_s21, %s1289_s27 }
   0xa   : > { %p1298_p11 = scmp.lt.s32.totalorder %s1289_s27, %s1289_s27 }
   0xb   : > { %p1280_p6 = pneg %p1462_p5 }
   0xc   : > { %p1299_p12 = por %p1298_p11, %p1297_p10 }
   0xd   : > { %p1292_p8 = pnand %p1290_p7, %p1280_p6 }
   0xf   : > { %p1293_p9 = pneg %p1292_p8 }
  0x11   : > { %p1300_p13 = pnand %p1299_p12, %p1293_p9 }
  0x13   : > { %1303 = shalt.err (!%p1300_p13)
}
  0x14   : > { %s1375_s28 = smov 128   ;;  %s1376_s29 = smov 8  }
  0x15   : > { %1248 = dma.hbm_to_vmem [thread:$0]  (!%p1462_p5), %s1629_s7, 2048, %s331_s21, [#allocation5], %s1375_s28, %s1375_s28, %s1376_s29  }
  0x16   : > { %s1315_s13 = scalar_lea.vmem %s315_s23, 2048  ;;  %p1323_p7 = scmp.lt.s32.totalorder %s315_s23, %s315_s23 }
  0x17   : > { %p1316_p0 = scmp.ne.s32.totalorder %s315_s23, %s1315_s13  ;;  %p1324_p8 = scmp.lt.s32.totalorder %s1315_s13, %s1315_s13 }
  0x19   : > { %p1318_p1 = pnand %p1316_p0, %p1280_p6  ;;  %p1325_p10 = por %p1324_p8, %p1323_p7 }
  0x1b   : > { %p1319_p4 = pneg %p1318_p1 }
  0x1d   : > { %p1326_p9 = pnand %p1325_p10, %p1319_p4 }
  0x1f   : > { %1329 = shalt.err (!%p1326_p9)
}
  0x20   : > { %1245 = dma.hbm_to_vmem [thread:$0]  (!%p1462_p5), %s1627_s5, 2048, %s315_s23, [#allocation3], %s1375_s28, %s1375_s28, %s1376_s29  }
  0x21   : > { %s1341_s16 = scalar_lea.vmem %s1466_s26, 2048  ;;  %p1349_p0 = scmp.lt.s32.totalorder %s1466_s26, %s1466_s26 }
  0x22   : > { %p1342_p11 = scmp.ne.s32.totalorder %s1466_s26, %s1341_s16  ;;  %p1350_p1 = scmp.lt.s32.totalorder %s1341_s16, %s1341_s16 }
  0x24   : > { %p1344_p12 = pnand %p1342_p11, %p1280_p6  ;;  %p1351_p4 = por %p1350_p1, %p1349_p0 }
  0x26   : > { %p1345_p13 = pneg %p1344_p12 }
  0x28   : > { %p1352_p7 = pnand %p1351_p4, %p1345_p13 }
  0x2a   : > { %1355 = shalt.err (!%p1352_p7)
}
  0x2b   : > { %1251 = dma.hbm_to_vmem [thread:$0]  (!%p1462_p5), %s1630_s8, 2048, %s1466_s26, [#allocation5], %s1375_s28, %s1375_s28, %s1376_s29  }
  0x2c   : > { %372 = sbr.rel (%p1454_p3) target bundleno = 693 (0x2b5), region = 64 }
  0x31   : > { %1361 = dma.done.wait (%p1252_p2), [#allocation3], 2048  }
  0x32   : > { %1363 = vsyncadd (%p1252_p2), [#allocation3], 4294965248 }
  0x33   : > { %1365 = dma.done.wait (%p1252_p2), [#allocation5], 4096  }
  0x34   : > { %1367 = vsyncadd (%p1252_p2), [#allocation5], 4294963200  ;;  %p418_p6 = scmp.lt.s32.totalorder %s1449_s18, 1  ;;  %v431_v0 = vlaneseq  ;;  %v1377_v1 = vmov 0.0   ;;  %v1378_v2 = vmov 1983009808  }
  0x35   : > { %1120 = vmatprep.subr.mxu0 %v1377_v1  ;;  %v429_v3 = vunpack.c.l.s4 %v1378_v2  ;;  %1125 = vmatprep.subr.mxu1 %v1377_v1  ;;  %v1379_v5 = vmov 1934713408   ;;  %vm1380_vm0 = vmmov 0   ;;  %v1381_v11 = vmov 0   ;;  %v477_v13 = vld [vmem:[%s1624_s2] sm:$0xff]  ;;  %v724_v16 = vld [vmem:[#allocation2 + $0x78] sm:$0xff] }
  0x36   : > { %s1637_s18 = smov (!%p418_p6, %s1449_s18), 1  ;;  %v1515_v4 = vshrl.u32 %v431_v0, 7  ;;  %v444_v6 = vunpack.c.l.s4 %v1379_v5  ;;  %1122 = vmatprep.mubr.msk.f32.mxu0 %vm1380_vm0, %v1377_v1  ;;  %1157 = vmatprep.mubr.msk.f32.mxu1 %vm1380_vm0, %v1377_v1  ;;  %v723_v17 = vld [vmem:[#allocation2 + $0x70] sm:$0xff]  ;;  %vm492_vm1 = vcmask 1041409   ;;  %vm495_vm2 = vcmask 1042434   ;;  %v476_v42 = vld [vmem:[%s1623_s1] sm:$0xff] }
  0x37   : > { %v430_v7 = vunpack.c.0.s8 %v429_v3  ;;  %s1059_s19 = sshll.u32 %s1637_s18, 3  ;;  %1277 = vset.pattern.permute.xlu0 %v1381_v11  ;;  %1126 = vmatpush3.msra.mxu1 %v724_v16  ;;  %vm498_vm3 = vcmask 1043459   ;;  %vm501_vm4 = vcmask 1044484   ;;  %vm504_vm5 = vcmask 1045509   ;;  %v722_v44 = vld [vmem:[#allocation2 + $0x68] sm:$0xff]  ;;  %v721_v45 = vld [vmem:[#allocation2 + $0x60] sm:$0xff] }
  0x38   : > { %v445_v8 = vunpack.c.0.s8 %v444_v6  ;;  %s421_s24 = scalar_lea.vmem %s1622_s0, %s1059_s19  ;;  %480 = vperm.xlu0 %1277, %v477_v13   ;;  %1127 = vmatprep.subr.mxu1 %v1377_v1  ;;  %vm507_vm6 = vcmask 1046534   ;;  %vm510_vm7 = vcmask 1047559   ;;  %vm513_vm8 = vcmask 64512   ;;  %v720_v46 = vld [vmem:[#allocation2 + $0x58] sm:$0xff]  ;;  %v719_v47 = vld [vmem:[#allocation2 + $0x50] sm:$0xff]  ;;  %v718_v48 = vld [vmem:[#allocation2 + $0x48] sm:$0xff]  ;;  %s425_s25 = scalar_lea.vmem %s1633_s11, %s1059_s19 }
  0x39   : > { %v433_v9 = vsub.s32 %v430_v7, %v1515_v4  ;;  %v1529_v12 = vld [vmem:[%s421_s24] sm:$0xff]  ;;  %1128 = vmatpush3.msra.mxu1 %v723_v17  ;;  %v716_v50 = vld [vmem:[#allocation2 + $0x38] sm:$0xff]  ;;  %v715_v51 = vld [vmem:[#allocation2 + $0x30] sm:$0xff] }
  0x3a   : > { %v448_v10 = vsub.s32 %v445_v8, %v1515_v4  ;;  %v427_v14 = vcombine.high %v1529_v12, %v1377_v1  ;;  %1129 = vmatprep.subr.mxu1 %v1377_v1  ;;  %v717_v49 = vld [vmem:[#allocation2 + $0x40] sm:$0xff]  ;;  %v714_v52 = vld [vmem:[#allocation2 + $0x28] sm:$0xff]  ;;  %v712_v54 = vld [vmem:[#allocation2 + $0x18] sm:$0xff] }
  0x3b   : > { %v434_v15 = vrot.slane %v1529_v12, %v433_v9  ;;  %1130 = vmatpush3.msra.mxu1 %v722_v44  ;;  %v713_v53 = vld [vmem:[#allocation2 + $0x20] sm:$0xff]  ;;  %v711_v55 = vld [vmem:[#allocation2 + $0x10] sm:$0xff]  ;;  %v710_v56 = vld [vmem:[#allocation2 + $0x8] sm:$0xff] }
  0x3c   : > { %v441_v18 = vrot.slane %v427_v14, %v433_v9  ;;  %1131 = vmatprep.subr.mxu1 %v1377_v1  ;;  %v709_v57 = vld [vmem:[#allocation2] sm:$0xff]  ;;  %v818_v58 = vld [vmem:[#allocation4 + $0x78] sm:$0xff]  ;;  %v817_v59 = vld [vmem:[#allocation4 + $0x70] sm:$0xff]  ;;  %v1382_v9 = vmov 1966171168  }
  0x3d   : > { %v442_v19 = vcombine.high %v434_v15, %v1377_v1  ;;  %v449_v20 = vrot.slane %v434_v15, %v448_v10  ;;  %1132 = vmatpush3.msra.mxu1 %v721_v45  ;;  %v816_v60 = vld [vmem:[#allocation4 + $0x68] sm:$0xff]  ;;  %v815_v61 = vld [vmem:[#allocation4 + $0x60] sm:$0xff]  ;;  %v814_v62 = vld [vmem:[#allocation4 + $0x58] sm:$0xff] }
  0x3e   : > { %v457_v22 = vcombine.high %v441_v18, %v1377_v1  ;;  %v464_v23 = vrot.slane %v441_v18, %v448_v10  ;;  %1133 = vmatprep.subr.mxu1 %v1377_v1  ;;  %v813_v63 = vld [vmem:[#allocation4 + $0x50] sm:$0xff]  ;;  %v812_v0 = vld [vmem:[#allocation4 + $0x48] sm:$0xff]  ;;  %v811_v2 = vld [vmem:[#allocation4 + $0x40] sm:$0xff] }
  0x3f   : > { %v456_v21 = vrot.slane %v442_v19, %v448_v10  ;;  %v472_v24 = vcombine.high %v449_v20, %v1377_v1  ;;  %1134 = vmatpush3.msra.mxu1 %v720_v46  ;;  %v810_v3 = vld [vmem:[#allocation4 + $0x38] sm:$0xff]  ;;  %v809_v5 = vld [vmem:[#allocation4 + $0x30] sm:$0xff]  ;;  %v808_v6 = vld [vmem:[#allocation4 + $0x28] sm:$0xff] }
  0x40   : > { %v471_v25 = vrot.slane %v457_v22, %v448_v10  ;;  %v474_v27 = vcombine.high %v464_v23, %v1377_v1  ;;  %v500_v30 = vrot.slane %v464_v23, 4  ;;  %1135 = vmatprep.subr.mxu1 %v1377_v1  ;;  %v807_v7 = vld [vmem:[#allocation4 + $0x20] sm:$0xff]  ;;  %v806_v8 = vld [vmem:[#allocation4 + $0x18] sm:$0xff]  ;;  %v591_v10 = vunpack.c.l.s4 %v1382_v9  ;;  %v707_v46 = vld [vmem:[#allocation6 + $0x70] sm:$0xff] }
  0x41   : > { %v473_v26 = vcombine.high %v456_v21, %v1377_v1  ;;  %v491_v28 = vrot.slane %v472_v24, 7  ;;  %v494_v29 = vrot.slane %v456_v21, 6  ;;  %1136 = vmatpush3.msra.mxu1 %v719_v47  ;;  %v708_v45 = vld [vmem:[#allocation6 + $0x78] sm:$0xff]  ;;  %v706_v47 = vld [vmem:[#allocation6 + $0x68] sm:$0xff]  ;;  %v959_v9 = vld [vmem:[%s1631_s9] sm:$0xff] }
  0x42   : > { %v475_v31 = vcombine.high %v471_v25, %v1377_v1  ;;  %v503_v34 = vrot.slane %v474_v27, 3  ;;  %v506_v36 = vrot.slane %v471_v25, 2  ;;  %1137 = vmatprep.subr.mxu1 %v1377_v1  ;;  %v592_v11 = vunpack.c.0.s8 %v591_v10 }
  0x43   : > { %v493_v32 = vsel %vm492_vm1, %v491_v28, %v449_v20  ;;  %v497_v33 = vrot.slane %v473_v26, 5  ;;  %1138 = vmatpush3.msra.mxu1 %v718_v48  ;;  %v704_v48 = vld [vmem:[#allocation6 + $0x58] sm:$0xff] }
  0x44   : > { %v496_v35 = vsel %vm495_vm2, %v494_v29, %v493_v32  ;;  %v509_v38 = vrot.slane %v475_v31, 1  ;;  %1139 = vmatprep.subr.mxu1 %v1377_v1  ;;  %v595_v15 = vsub.s32 %v592_v11, %v1515_v4 }
  0x45   : > { %v499_v37 = vsel %vm498_vm3, %v497_v33, %v496_v35  ;;  %1140 = vmatpush3.msra.mxu1 %v717_v49  ;;  %v703_v49 = vld [vmem:[#allocation6 + $0x50] sm:$0xff] }
  0x46   : > { %v502_v39 = vsel %vm501_vm4, %v500_v30, %v499_v37  ;;  %1141 = vmatprep.subr.mxu1 %v1377_v1 }
  0x47   : > { %v505_v40 = vsel %vm504_vm5, %v503_v34, %v502_v39  ;;  %1142 = vmatpush3.msra.mxu1 %v716_v50  ;;  %v702_v50 = vld [vmem:[#allocation6 + $0x48] sm:$0xff] }
  0x48   : > { %v508_v41 = vsel %vm507_vm6, %v506_v36, %v505_v40  ;;  %1143 = vmatprep.subr.mxu1 %v1377_v1  ;;  %v689_v40 = vld [vmem:[%s1625_s3] sm:$0xff] }
  0x49   : > { %v511_v43 = vsel %vm510_vm7, %v509_v38, %v508_v41  ;;  %1144 = vmatpush3.msra.mxu1 %v715_v51  ;;  %v701_v51 = vld [vmem:[#allocation6 + $0x40] sm:$0xff] }
  0x4a   : > { %1121 = vmatpush3.msra.mxu0 %v511_v43  ;;  %1145 = vmatprep.subr.mxu1 %v1377_v1 }
  0x4b   : > { %1123 = vmatmul.mubr.msk.f32.vlgmr.msra.gmra.mxu0 %vm513_vm8, %v476_v42  ;;  %1160 = vmatprep.subr.mxu0 %v1377_v1  ;;  %v691_v42 = vld [vmem:[%s1626_s4] sm:$0xff] }
  0x4c   : > { %1192 = vmatprep.mubr.msk.f32.mxu0 %vm1380_vm0, %v1377_v1  ;;  %1146 = vmatpush3.msra.mxu1 %v714_v52  ;;  %v700_v52 = vld [vmem:[#allocation6 + $0x38] sm:$0xff] }
  0x4d   : > { %1147 = vmatprep.subr.mxu1 %v1377_v1  ;;  %1161 = vmatpush3.msra.mxu0 %v818_v58  ;;  %v694_v58 = vld [vmem:[#allocation6 + $0x8] sm:$0xff] }
  0x4e   : > { %1148 = vmatpush3.msra.mxu1 %v713_v53  ;;  %1162 = vmatprep.subr.mxu0 %v1377_v1  ;;  %v699_v53 = vld [vmem:[#allocation6 + $0x30] sm:$0xff] }
  0x4f   : > { %1149 = vmatprep.subr.mxu1 %v1377_v1  ;;  %1163 = vmatpush3.msra.mxu0 %v817_v59  ;;  %v693_v59 = vld [vmem:[#allocation6] sm:$0xff] }
  0x50   : > { %1150 = vmatpush3.msra.mxu1 %v712_v54  ;;  %1164 = vmatprep.subr.mxu0 %v1377_v1  ;;  %v698_v54 = vld [vmem:[#allocation6 + $0x28] sm:$0xff] }
  0x51   : > { %1151 = vmatprep.subr.mxu1 %v1377_v1  ;;  %1165 = vmatpush3.msra.mxu0 %v816_v60  ;;  %v805_v60 = vld [vmem:[#allocation4 + $0x10] sm:$0xff] }
  0x52   : > { %1152 = vmatpush3.msra.mxu1 %v711_v55  ;;  %1166 = vmatprep.subr.mxu0 %v1377_v1  ;;  %v697_v55 = vld [vmem:[#allocation6 + $0x20] sm:$0xff] }
  0x53   : > { %1153 = vmatprep.subr.mxu1 %v1377_v1  ;;  %1167 = vmatpush3.msra.mxu0 %v815_v61  ;;  %v804_v61 = vld [vmem:[#allocation4 + $0x8] sm:$0xff] }
  0x54   : > { %1154 = vmatpush3.msra.mxu1 %v710_v56  ;;  %1168 = vmatprep.subr.mxu0 %v1377_v1  ;;  %v696_v56 = vld [vmem:[#allocation6 + $0x18] sm:$0xff] }
  0x55   : > { %1155 = vmatprep.subr.mxu1 %v1377_v1  ;;  %1169 = vmatpush3.msra.mxu0 %v814_v62  ;;  %v803_v62 = vld [vmem:[#allocation4] sm:$0xff] }
  0x56   : > { %1156 = vmatpush3.msra.mxu1 %v709_v57  ;;  %1170 = vmatprep.subr.mxu0 %v1377_v1  ;;  %v695_v57 = vld [vmem:[#allocation6 + $0x10] sm:$0xff] }
  0x57   : > { %1195 = vmatprep.subr.mxu1 %v1377_v1  ;;  %1171 = vmatpush3.msra.mxu0 %v813_v63  ;;  %v1064_v63 = vld [vmem:[%s1628_s6] ss:$0 sm:$0xff] }
  0x58   : > { %1172 = vmatprep.subr.mxu0 %v1377_v1 }
  0x59   : > { %1173 = vmatpush3.msra.mxu0 %v812_v0 }
  0x5a   : > { %1174 = vmatprep.subr.mxu0 %v1377_v1 }
  0x5b   : > { %1175 = vmatpush3.msra.mxu0 %v811_v2 }
  0x5c   : > { %1176 = vmatprep.subr.mxu0 %v1377_v1 }
  0x5d   : > { %1177 = vmatpush3.msra.mxu0 %v810_v3 }
  0x5e   : > { %1178 = vmatprep.subr.mxu0 %v1377_v1 }
  0x5f   : > { %1179 = vmatpush3.msra.mxu0 %v809_v5 }
  0x60   : > { %1180 = vmatprep.subr.mxu0 %v1377_v1 }
  0x61   : > { %1181 = vmatpush3.msra.mxu0 %v808_v6 }
  0x62   : > { %1182 = vmatprep.subr.mxu0 %v1377_v1 }
  0x63   : > { %1183 = vmatpush3.msra.mxu0 %v807_v7 }
  0x64   : > { %1184 = vmatprep.subr.mxu0 %v1377_v1 }
  0x65   : > { %1185 = vmatpush3.msra.mxu0 %v806_v8 }
  0x66   : > { %1186 = vmatprep.subr.mxu0 %v1377_v1 }
  0x67   : > { %1187 = vmatpush3.msra.mxu0 %v805_v60 }
  0x68   : > { %1188 = vmatprep.subr.mxu0 %v1377_v1 }
  0x69   : > { %1189 = vmatpush3.msra.mxu0 %v804_v61 }
  0x6a   : > { %1190 = vmatprep.subr.mxu0 %v1377_v1 }
  0x6b   : > { %1191 = vmatpush3.msra.mxu0 %v803_v62 }
  0xb3   : > { %v481_v13 = vpop.permute.xlu0 %480 }
 0x10b   : > { %v583_v14 = vpop.f32.mrf.mxu0 }
 0x10c   : > { %v584_v16 = vadd.f32 %v583_v14, %v481_v13 }
 0x10d   : > { %v1124_v17 = vpop.f32.mrf.mxu0 }
 0x10e   : > { %v587_v18 = vmax.f32 %v584_v16, 0.0 }
 0x110   : > { %v589_v19 = vcombine.high %v587_v18, %v587_v18  ;;  %v596_v20 = vrot.slane %v587_v18, %v595_v15 }
 0x112   : > { %v603_v21 = vrot.slane %v589_v19, %v595_v15  ;;  %v604_v22 = vcombine.high %v596_v20, %v596_v20  ;;  %v612_v24 = vrot.slane %v596_v20, %v595_v15 }
 0x114   : > { %v605_v23 = vcombine.high %v603_v21, %v603_v21  ;;  %v626_v25 = vrot.slane %v604_v22, %v595_v15  ;;  %v619_v26 = vrot.slane %v603_v21, %v595_v15 }
 0x116   : > { %v633_v27 = vrot.slane %v605_v23, %v595_v15  ;;  %v638_v28 = vcombine.low %v612_v24, %v626_v25  ;;  %v1062_v29 = vcombine.high %v612_v24, %v626_v25 }
 0x118   : > { %v640_v30 = vcombine.low %v619_v26, %v633_v27  ;;  %v1063_v31 = vcombine.high %v619_v26, %v633_v27  ;;  %v648_v32 = vrot.slane %v638_v28, %v595_v15  ;;  %v655_v33 = vrot.slane %v1062_v29, %v595_v15 }
 0x11a   : > { %v662_v34 = vrot.slane %v640_v30, %v595_v15  ;;  %v669_v4 = vrot.slane %v1063_v31, %v595_v15  ;;  %v670_v35 = vcombine.low %v648_v32, %v655_v33 }
 0x11c   : > { %v671_v36 = vcombine.low %v662_v34, %v669_v4  ;;  %v678_v37 = vrot.slane %v670_v35, %v595_v15 }
 0x11e   : > { %v685_v38 = vrot.slane %v671_v36, %v595_v15 }
 0x120   : > { %v686_v39 = vcombine.low %v678_v37, %v685_v38 }
 0x122   : > { %v688_v41 = vadd.f32 %v686_v39, %v1529_v12  ;;  %v705_v12 = vld [vmem:[#allocation6 + $0x60] sm:$0xff] }
 0x124   : > { %v690_v43 = vmul.f32 %v689_v40, %v688_v41 }
 0x126   : > { %v692_v44 = vadd.f32 %v691_v42, %v690_v43 }
 0x128   : > { %1158 = vmatmul.mubr.f32.vlgmr.msra.gmra.mxu1 %v692_v44 }
 0x129   : > { %1196 = vmatpush3.msra.mxu1 %v708_v45  ;;  %1227 = vmatprep.mubr.msk.f32.mxu1 %vm1380_vm0, %v1377_v1 }
 0x12a   : > { %1197 = vmatprep.subr.mxu1 %v1377_v1 }
 0x12b   : > { %1198 = vmatpush3.msra.mxu1 %v707_v46 }
 0x12c   : > { %1199 = vmatprep.subr.mxu1 %v1377_v1 }
 0x12d   : > { %1200 = vmatpush3.msra.mxu1 %v706_v47 }
 0x12e   : > { %1201 = vmatprep.subr.mxu1 %v1377_v1 }
 0x12f   : > { %1202 = vmatpush3.msra.mxu1 %v705_v12 }
 0x130   : > { %1203 = vmatprep.subr.mxu1 %v1377_v1 }
 0x131   : > { %1204 = vmatpush3.msra.mxu1 %v704_v48 }
 0x132   : > { %1205 = vmatprep.subr.mxu1 %v1377_v1 }
 0x133   : > { %1206 = vmatpush3.msra.mxu1 %v703_v49 }
 0x134   : > { %1207 = vmatprep.subr.mxu1 %v1377_v1 }
 0x135   : > { %1208 = vmatpush3.msra.mxu1 %v702_v50 }
 0x136   : > { %1209 = vmatprep.subr.mxu1 %v1377_v1 }
 0x137   : > { %1210 = vmatpush3.msra.mxu1 %v701_v51 }
 0x138   : > { %1211 = vmatprep.subr.mxu1 %v1377_v1 }
 0x139   : > { %1212 = vmatpush3.msra.mxu1 %v700_v52 }
 0x13a   : > { %1213 = vmatprep.subr.mxu1 %v1377_v1 }
 0x13b   : > { %1214 = vmatpush3.msra.mxu1 %v699_v53 }
 0x13c   : > { %1215 = vmatprep.subr.mxu1 %v1377_v1 }
 0x13d   : > { %1216 = vmatpush3.msra.mxu1 %v698_v54 }
 0x13e   : > { %1217 = vmatprep.subr.mxu1 %v1377_v1 }
 0x13f   : > { %1218 = vmatpush3.msra.mxu1 %v697_v55 }
 0x140   : > { %1219 = vmatprep.subr.mxu1 %v1377_v1 }
 0x141   : > { %1220 = vmatpush3.msra.mxu1 %v696_v56 }
 0x142   : > { %1221 = vmatprep.subr.mxu1 %v1377_v1 }
 0x143   : > { %1222 = vmatpush3.msra.mxu1 %v695_v57 }
 0x144   : > { %1223 = vmatprep.subr.mxu1 %v1377_v1 }
 0x145   : > { %1224 = vmatpush3.msra.mxu1 %v694_v58 }
 0x146   : > { %1225 = vmatprep.subr.mxu1 %v1377_v1  ;;  %v961_v1 = vld [vmem:[%s1632_s10] sm:$0xff] }
 0x147   : > { %1226 = vmatpush3.msra.mxu1 %v693_v59 }
 0x148   : > { %1228 = vmatmul.mubr.f32.vlgmr.msra.gmra.mxu1 %v692_v44 }
 0x1e8   : > { %v798_v0 = vpop.f32.mrf.mxu1 }
 0x1e9   : > { %v799_v2 = vadd.f32 %v1064_v63, %v798_v0 }
 0x1ea   : > { %v1159_v3 = vpop.f32.mrf.mxu1 }
 0x1eb   : > { %v802_v5 = vmax.f32 %v799_v2, 0.0 }
 0x1ed   : > { %1193 = vmatmul.mubr.f32.vlgmr.msra.gmra.mxu0 %v802_v5 }
 0x208   : > { %v955_v6 = vpop.f32.mrf.mxu1 }
 0x20a   : > { %v1229_v7 = vpop.f32.mrf.mxu1 }
 0x2ad   : > { %v885_v8 = vpop.f32.mrf.mxu0 }
 0x2ae   : > { %v956_v10 = vadd.f32 %v955_v6, %v885_v8 }
 0x2af   : > { %v1194_v11 = vpop.f32.mrf.mxu0 }
 0x2b0   : > { %v960_v13 = vmul.f32 %v959_v9, %v956_v10 }
 0x2b2   : > { %v962_v14 = vadd.f32 %v961_v1, %v960_v13 }
 0x2b4   : > { %963 = vst [vmem:[%s425_s25] sm:$0xff] %v962_v14 }
 0x2b5 PF: > { %s23_s17 = sadd.s32 1, %s1370_s17  }
 0x2b6   : > { %p20_p2 = scmp.ge.s32.totalorder %s23_s17, 4  }
 0x2b8   :  { %22 = sbr.rel (!%p20_p2) target bundleno = 2 (0x2), region = 107 }
 0x2bd   :  { %983 = vsyncpa [#allocation3], 1 }
 0x2be   :  { %985 = vsyncpa [#allocation3 + $0x1], 1 }
 0x2bf   :  { %986 = vsyncpa [#allocation5], 1 }

</bundles_post_ra>
